<compile_context>
chip_gen: v6e
topology: v6e:2x2x1
jax: 0.10.0
libtpu: 0.0.40
codegen_flags: <defaults>
</compile_context>

<pallas_src>
import math

import jax
import jax.numpy as jnp
from jax import lax
from jax.experimental import pallas as pl
from jax.experimental.pallas import tpu as pltpu


def _renyi_fwd_kernel(logits_ref, w_ref, out_ref):
    """Fused softmax (over last dim) + NT matmul with the (D_pad, C) encoding."""
    x = logits_ref[...].astype(jnp.float32)                       # (TB, C), f32 math
    # numerically-stable softmax over categories (dim=1), f32 on the VPU/EUP
    m = jnp.max(x, axis=1, keepdims=True)
    e = jnp.exp(x - m)
    inv = pl.reciprocal(jnp.sum(e, axis=1, keepdims=True), approx=True)   # EUP vrcp
    probs = (e * inv).astype(w_ref.dtype)                         # bf16 MXU operand
    # (TB, C) · (D_pad, C) contracting the C axis of both -> (TB, D_pad), f32 acc
    acc = lax.dot_general(
        probs, w_ref[...],
        dimension_numbers=(((1,), (1,)), ((), ())),
        preferred_element_type=jnp.float32)
    out_ref[...] = acc.astype(out_ref.dtype)


def renyi_entropy_regularization_forward(id_logits, category_encoding, *,
                                         block_b=None,
                                         weight_dtype=jnp.bfloat16):
    """
    Args:
      id_logits:          (B, num_categories) float array
      category_encoding:  (feature_dim, num_categories) parameter (PyTorch layout)
    Returns:
      category_features:  (B, feature_dim), dtype of id_logits
    """
    B, C = id_logits.shape
    D, C2 = category_encoding.shape
    assert C == C2, "num_categories mismatch"

    in_dtype = id_logits.dtype
    sublane = 16 if in_dtype == jnp.bfloat16 else 8

    # ---- pick a batch tile: multiple of the sublane tile, ~512 rows target ----
    if block_b is None:
        block_b = 512
    block_b = max(sublane, (block_b // sublane) * sublane)
    b_padded_min = ((B + sublane - 1) // sublane) * sublane
    block_b = min(block_b, b_padded_min)

    num_blocks = pl.cdiv(B, block_b)
    B_pad = num_blocks * block_b

    # ---- lane-dense output: pad feature dim up to a multiple of 128 ----
    D_pad = ((D + 127) // 128) * 128

    # ---- pad inputs (ragged batch handled by padding, not asserts) ----
    logits_p = id_logits
    if B_pad != B:
        logits_p = jnp.pad(id_logits, ((0, B_pad - B), (0, 0)))

    # Keep the parameter in its (D, C) PyTorch layout — no transpose round-trip.
    w = category_encoding.astype(weight_dtype)
    if D_pad != D:
        w = jnp.pad(w, ((0, D_pad - D), (0, 0)))

    # ---- VMEM budget: 2x logits tile + 2x out tile + 2x weight, +25% headroom ----
    in_bytes = jnp.dtype(in_dtype).itemsize
    w_bytes = jnp.dtype(weight_dtype).itemsize
    vmem_need = int(1.25 * (2 * block_b * C * in_bytes
                            + 2 * block_b * D_pad * in_bytes
                            + 2 * D_pad * C * w_bytes))
    vmem_limit = min(max(vmem_need, 16 * 1024 * 1024), 48 * 1024 * 1024)

    out = pl.pallas_call(
        _renyi_fwd_kernel,
        out_shape=jax.ShapeDtypeStruct((B_pad, D_pad), in_dtype),
        grid_spec=pltpu.PrefetchScalarGridSpec(
            num_scalar_prefetch=0,
            grid=(num_blocks,),
            in_specs=[
                # logits tiled along batch; last dim = full C (equals array dim)
                pl.BlockSpec((block_b, C), lambda i: (i, 0)),
                # full (D_pad, C) bf16 weight resident in VMEM for every step
                pl.BlockSpec((D_pad, C), lambda i: (0, 0)),
            ],
            out_specs=pl.BlockSpec((block_b, D_pad), lambda i: (i, 0)),
        ),
        compiler_params=pltpu.CompilerParams(
            dimension_semantics=("parallel",),
            vmem_limit_bytes=vmem_limit,
        ),
    )(logits_p, w)

    # strip batch / feature padding
    return out[:B, :D]


def _reference_forward(id_logits, category_encoding):
    probs = jax.nn.softmax(id_logits, axis=1)
    return probs @ category_encoding.T


if __name__ == "__main__":
    # Small, module-consistent shapes.
    batch = 8
    num_categories = 10
    feature_dim = 64

    key = jax.random.PRNGKey(0)
    k_logits, k_weight = jax.random.split(key)

    # Deterministic "xavier_normal_" init of category_encoding (feature_dim, num_categories):
    # std = sqrt(2 / (fan_in + fan_out))
    xavier_std = math.sqrt(2.0 / (feature_dim + num_categories))
    category_encoding = (
        jax.random.normal(k_weight, (feature_dim, num_categories), dtype=jnp.float32)
        * xavier_std
    )

    id_logits = jax.random.normal(k_logits, (batch, num_categories), dtype=jnp.float32)

    out = renyi_entropy_regularization_forward(id_logits, category_encoding)
    out = jax.block_until_ready(out)

    ref = _reference_forward(id_logits, category_encoding)
    assert out.shape == (batch, feature_dim), out.shape
    # bf16 MXU operands + approx reciprocal -> looser tolerance than pure f32.
    assert jnp.allclose(out, ref, atol=1e-2, rtol=1e-2), "mismatch vs JAX reference"

    # TODO(synk): compute_regularization() (eigvalsh / matrix_power path) is not part of
    # forward() and is left to plain JAX if needed.
    print("KERNEL_OK")
</pallas_src>

<mosaic_0001>
module attributes {stable_mosaic.version = 11 : i64} {
  func.func @_renyi_fwd_kernel(%arg0: i32, %arg1: memref<8x10xf32, #tpu.memory_space<vmem>>, %arg2: memref<128x10xbf16, #tpu.memory_space<vmem>>, %arg3: memref<8x128xf32, #tpu.memory_space<vmem>>) attributes {dimension_semantics = [#tpu.dimension_semantics<parallel>], iteration_bounds = array<i64: 1>, scalar_prefetch = 0 : i64, scratch_operands = 0 : i64, tpu.core_type = #tpu.core_type<tc>, window_params = [{transform_indices = @transform_0, window_bounds = array<i64: 8, 10>}, {pipeline_mode = #tpu.pipeline_mode<synchronous>, transform_indices = @transform_1, window_bounds = array<i64: 128, 10>}, {transform_indices = @transform_2, window_bounds = array<i64: 8, 128>}]} {
    %c0 = arith.constant 0 : index
    %c0_0 = arith.constant 0 : index
    %0 = vector.load %arg1[%c0, %c0_0] : memref<8x10xf32, #tpu.memory_space<vmem>>, vector<8x10xf32>
    %cst = arith.constant dense<0xFF800000> : vector<8xf32>
    %1 = vector.multi_reduction <maximumf>, %0, %cst [1] : vector<8x10xf32> to vector<8xf32>
    %2 = vector.shape_cast %1 : vector<8xf32> to vector<8x1xf32>
    %3 = vector.broadcast %2 : vector<8x1xf32> to vector<8x10xf32>
    %4 = arith.subf %0, %3 : vector<8x10xf32>
    %5 = math.exp %4 : vector<8x10xf32>
    %cst_1 = arith.constant dense<0.000000e+00> : vector<8xf32>
    %6 = vector.multi_reduction <add>, %5, %cst_1 [1] : vector<8x10xf32> to vector<8xf32>
    %7 = vector.shape_cast %6 : vector<8xf32> to vector<8x1xf32>
    %8 = tpu.reciprocal %7 {approx = true} : vector<8x1xf32> -> vector<8x1xf32>
    %9 = vector.broadcast %8 : vector<8x1xf32> to vector<8x10xf32>
    %10 = arith.mulf %5, %9 : vector<8x10xf32>
    %11 = arith.truncf %10 : vector<8x10xf32> to vector<8x10xbf16>
    %c0_2 = arith.constant 0 : index
    %c0_3 = arith.constant 0 : index
    %12 = vector.load %arg2[%c0_2, %c0_3] : memref<128x10xbf16, #tpu.memory_space<vmem>>, vector<128x10xbf16>
    %cst_4 = arith.constant dense<0.000000e+00> : vector<8x128xf32>
    %13 = tpu.matmul %11, %12, %cst_4 {dimension_numbers = #tpu.dot_dimension_numbers<[1], [1], [0], [0], [0, 0, 1, 0], [], []>} : vector<8x10xbf16>, vector<128x10xbf16>, vector<8x128xf32> -> vector<8x128xf32>
    %c0_5 = arith.constant 0 : index
    %c0_6 = arith.constant 0 : index
    %14 = vector.load %arg3[%c0_5, %c0_6] : memref<8x128xf32, #tpu.memory_space<vmem>>, vector<8x128xf32>
    tpu.vector_store %arg3[%c0_5, %c0_6], %13 {strides = array<i32>} : memref<8x128xf32, #tpu.memory_space<vmem>>, vector<8x128xf32>,
    return
  }
  func.func @transform_0(%arg0: i32) -> (i32, i32) {
    %c0_i32 = arith.constant 0 : i32
    %c0_i32_0 = arith.constant 0 : i32
    return %arg0, %c0_i32 : i32, i32
  }
  func.func @transform_1(%arg0: i32) -> (i32, i32) {
    %c0_i32 = arith.constant 0 : i32
    %c0_i32_0 = arith.constant 0 : i32
    %c0_i32_1 = arith.constant 0 : i32
    return %c0_i32, %c0_i32_0 : i32, i32
  }
  func.func @transform_2(%arg0: i32) -> (i32, i32) {
    %c0_i32 = arith.constant 0 : i32
    %c0_i32_0 = arith.constant 0 : i32
    return %arg0, %c0_i32 : i32, i32
  }
}

</mosaic_0001>

<bundles_post_ra>
// kernel: tpu_custom_call.1
= control target key start
LH: loop header
LB: loop body
LE: loop exit
PB: predicated region body
PF: predicated region fallthrough
CT: control target
= control target key end

     0   :  { %vm14_vm0 = vcmask 80896   ;;  %s299_s0 = inlined_call_operand.vmem [shape: f32[8,10], index: 0, kind: input, shape index: {}]   ;;  %s300_s1 = inlined_call_operand.vmem [shape: bf16[128,10], index: 1, kind: input, shape index: {}]   ;;  %s301_s2 = inlined_call_operand.hbm [shape: f32[8,128], index: 2, kind: output, shape index: {}]  }
   0x1   :  { %v13_v0 = vld [vmem:[%s299_s0] sm:$0xff] }
   0x2   :  { %v15_v1 = vsel %vm14_vm0, %v13_v0, -inf }
   0x3   :  { %16 = vmax.xlane.f32.xlu0 %v15_v1 }
   0x4   :  { %7 = vsyncpa [#allocation3], 0  ;;  %v206_v2 = vld [vmem:[%s300_s1 + $0x38] sm:$0xff]   ;;  %v240_v3 = vmov 0.0   ;;  %v207_v5 = vld [vmem:[%s300_s1 + $0x30] sm:$0xff]   ;;  %vm241_vm1 = vmmov 0  }
   0x5   :  { %183 = vmatprep.subr.bf16.mxu0 %v240_v3  ;;  %v108_v4 = vsel %vm14_vm0, %v206_v2, 0  ;;  %v105_v6 = vsel %vm14_vm0, %v207_v5, 0  ;;  %v208_v7 = vld [vmem:[%s300_s1 + $0x28] sm:$0xff]   ;;  %v209_v9 = vld [vmem:[%s300_s1 + $0x20] sm:$0xff]   ;;  %v210_v11 = vld [vmem:[%s300_s1 + $0x18] sm:$0xff]   ;;  %199 = vmatprep.mubr.msk.bf16.mxu0 %vm241_vm1, %v240_v3  ;;  %s242_s26 = smov [#allocation2]  }
   0x6   :  { %184 = vmatpush3.bf16.xpose.msra.mxu0 %v108_v4  ;;  %v102_v8 = vsel %vm14_vm0, %v208_v7, 0  ;;  %v99_v10 = vsel %vm14_vm0, %v209_v9, 0  ;;  %v96_v12 = vsel %vm14_vm0, %v210_v11, 0  ;;  %v211_v13 = vld [vmem:[%s300_s1 + $0x10] sm:$0xff]   ;;  %v212_v20 = vld [vmem:[%s300_s1 + $0x8] sm:$0xff]   ;;  %v213_v22 = vld [vmem:[%s300_s1] sm:$0xff]  }
   0x7   :  { %185 = vmatprep.subr.bf16.mxu0 %v240_v3  ;;  %v93_v14 = vsel %vm14_vm0, %v211_v13, 0  ;;  %v90_v21 = vsel %vm14_vm0, %v212_v20, 0  ;;  %v87_v23 = vsel %vm14_vm0, %v213_v22, 0  ;;  %s157_s27 = sshll.u32 %s242_s26, 4  ;;  %s158_s27 = int_to_ptr.vmem [resolvable:$true] %s157_s27 }
   0x8   :  { %s218_s28 = scalar_lea.vmem %s158_s27, 128  ;;  %p223_p1 = scmp.lt.s32.totalorder %s158_s27, %s158_s27 }
   0x9   :  { %p219_p0 = scmp.ne.s32.totalorder %s158_s27, %s218_s28  ;;  %p224_p2 = scmp.lt.s32.totalorder %s218_s28, %s218_s28 }
   0xb   :  { %p225_p3 = por %p224_p2, %p223_p1 }
   0xd   :  { %p226_p4 = pnand %p225_p3, %p219_p0 }
   0xe   :  { %186 = vmatpush3.bf16.xpose.msra.mxu0 %v105_v6 }
   0xf   :  { %187 = vmatprep.subr.bf16.mxu0 %v240_v3 }
  0x16   :  { %188 = vmatpush3.bf16.xpose.msra.mxu0 %v102_v8 }
  0x17   :  { %189 = vmatprep.subr.bf16.mxu0 %v240_v3 }
  0x1e   :  { %190 = vmatpush3.bf16.xpose.msra.mxu0 %v99_v10 }
  0x1f   :  { %191 = vmatprep.subr.bf16.mxu0 %v240_v3 }
  0x26   :  { %192 = vmatpush3.bf16.xpose.msra.mxu0 %v96_v12 }
  0x27   :  { %193 = vmatprep.subr.bf16.mxu0 %v240_v3 }
  0x2e   :  { %194 = vmatpush3.bf16.xpose.msra.mxu0 %v93_v14 }
  0x2f   :  { %195 = vmatprep.subr.bf16.mxu0 %v240_v3 }
  0x36   :  { %196 = vmatpush3.bf16.xpose.msra.mxu0 %v90_v21 }
  0x37   :  { %197 = vmatprep.subr.bf16.mxu0 %v240_v3 }
  0x3e   :  { %198 = vmatpush3.bf16.xpose.msra.mxu0 %v87_v23 }
  0x8c   :  { %v17_v15 = vpop.xlane.xlu0 %16 }
  0x8d   :  { %v18_v16 = vsub.f32 %v13_v0, %v17_v15 }
  0x8f   :  { %v19_v17 = vmul.f32 1.442695, %v18_v16 }
  0x91   :  { %214 = vpow2.f32 %v19_v17 }
  0x9e   :  { %v215_v18 = vpop.eup %214 }
  0x9f   :  { %v21_v19 = vsel %vm14_vm0, %v215_v18, 0.0 }
  0xa0   :  { %22 = vadd.xlane.f32.xlu0 %v21_v19 }
 0x129   :  { %v23_v24 = vpop.xlane.xlu0 %22 }
 0x12a   :  { %216 = vrcp.f32 %v23_v24 }
 0x137   :  { %v217_v25 = vpop.eup %216 }
 0x138   :  { %v25_v26 = vmul.f32 %v217_v25, %v215_v18 }
 0x13a   :  { %v26_v27 = vpack.c.bf16 %v25_v26, %v25_v26 }
 0x13c   :  { %200 = vmatmul.mubr.msk.bf16.vlgmr.msra.gmra.mxu0 %vm14_vm0, %v26_v27 }
 0x1fc   :  { %v144_v28 = vpop.f32.mrf.mxu0 }
 0x1fd   :  { %150 = vst [vmem:[#allocation2] sm:$0xff] %v144_v28 }
 0x1fe   :  { %v201_v29 = vpop.f32.mrf.mxu0 }
 0x1ff   :  { %229 = shalt.err (!%p226_p4)
}
 0x200   :  { %160 = dma.vmem_to_hbm [thread:$0]  %s158_s27, 128, %s301_s2, [#allocation3]   ;;  %v147_v30 = vpop.f32.mrf.mxu0 }
 0x202   :  { %v202_v31 = vpop.f32.mrf.mxu0 }
 0x203   :  { %238 = dma.done.wait [#allocation3], 128  }
 0x204   :  { %239 = vsyncadd [#allocation3], 4294967168 }
 0x205   :  { %164 = vsyncpa [#allocation3], 1 }

</bundles_post_ra>
